<compile_context>
chip_gen: v6e
topology: v6e:2x2x1
jax: 0.10.0
libtpu: 0.0.40
codegen_flags: <defaults>
</compile_context>

<pallas_src>
import functools

import jax
import jax.numpy as jnp
from jax.experimental import pallas as pl
from jax.experimental.pallas import tpu as pltpu


def _frozen_bn_kernel(x_ref, p_ref, o_ref, *, fuse_relu):
    # x_ref/o_ref: (rb, cb) tiles; p_ref: (rb, 2) f32 merged [scale, shift].
    x = x_ref[...].astype(jnp.float32)
    scale = p_ref[:, 0:1]
    shift = p_ref[:, 1:2]
    y = x * scale + shift
    if fuse_relu:
        y = jnp.maximum(y, 0.0)
    o_ref[...] = y.astype(o_ref.dtype)


def _cdiv(a, b):
    return -(-a // b)


def _round_down(x, m):
    return max(m, (x // m) * m)


def _round_up(x, m):
    return _cdiv(x, m) * m


def _choose_blocks(rows, cols, itemsize, sublane, block_bytes, target_grid=4):
    """Pick (row_block, lane_block) near block_bytes with >= target_grid steps."""
    # Lane (column) block: full extent when cheap, else a multiple of 128.
    if cols * itemsize * sublane <= block_bytes:
        cb = cols
    else:
        cb = min(cols, _round_down(block_bytes // (sublane * itemsize), 128))
    # Row (sublane) block sized off the lane-PADDED width so the real VMEM
    # block stays near block_bytes even when H*W < 128 (masked-lane layers).
    cb_pad = _round_up(cb, 128)
    rb = _round_down(block_bytes // (cb_pad * itemsize), sublane)
    if rb >= rows:
        rb = rows  # full-extent block is always a legal block shape
    nr, nc = _cdiv(rows, rb), _cdiv(cols, cb)

    # Aim for >= target_grid iterations so v7x's two TensorCores each get >= 2
    # steps and the pipeline has something to overlap. Split rows first, then
    # lanes (only in 128-multiples).
    if nr * nc < target_grid:
        want_nr = min(_cdiv(rows, sublane), _cdiv(target_grid, nc))
        rb = min(rb, _round_down(_cdiv(rows, max(want_nr, 1)), sublane))
        nr = _cdiv(rows, rb)
    if nr * nc < target_grid and cols >= 2 * 128:
        want_nc = min(cols // 128, _cdiv(target_grid, nr))
        cb = min(cb, _round_down(_cdiv(cols, max(want_nc, 1)), 128))
        nc = _cdiv(cols, cb)
    return rb, cb


def frozen_batch_norm_2d(
    x, weight, bias, running_mean, running_var, eps=1e-5,
    *, fuse_relu=False, block_bytes=4 << 20,
):
    """y = x * (w * rsqrt(rv + eps)) + (b - rm * w * rsqrt(rv + eps)) per channel (NCHW)."""
    N, C, H, W = x.shape
    rows, cols = N * C, H * W
    itemsize = jnp.dtype(x.dtype).itemsize
    sublane = max(8, 32 // itemsize)  # 8 for f32, 16 for bf16

    # Per-channel affine, computed once in f32 and merged into one array:
    #   params[:, 0] = scale,  params[:, 1] = shift
    w32 = weight.astype(jnp.float32)
    b32 = bias.astype(jnp.float32)
    rm32 = running_mean.astype(jnp.float32)
    rv32 = running_var.astype(jnp.float32)
    scale = w32 * jax.lax.rsqrt(rv32 + jnp.float32(eps))            # (C,)
    shift = b32 - rm32 * scale                                       # (C,)
    params = jnp.tile(jnp.stack([scale, shift], axis=-1), (N, 1))    # (N*C, 2) f32

    x2 = x.reshape(rows, cols)  # lane-dense slab: spatial plane on the lane axis
    # TODO(synk): for tiny spatial planes (H*W < 128, e.g. 7x7 stages) a
    # C-on-lanes NHWC variant would avoid masked vst; with NCHW input we accept
    # the lane-padding penalty rather than paying an HBM transpose.

    # Cap block_bytes so 2*(in+out) blocks + params always fit v7x's 64 MiB VMEM.
    block_bytes = min(block_bytes, 8 << 20)
    rb, cb = _choose_blocks(rows, cols, itemsize, sublane, block_bytes)
    nr, nc = _cdiv(rows, rb), _cdiv(cols, cb)

    # Couple the scoped-VMEM limit to the actual (lane-padded) block sizes.
    x_blk = _round_up(rb, sublane) * _round_up(cb, 128) * itemsize
    p_blk = _round_up(rb, sublane) * 128 * 4
    # TODO(synk): pipeline_mode=pl.Buffered(1) on the param spec would single-
    # buffer the tiny (rb, 2) transfer and shave ~p_blk of VMEM.
    vmem_need = 2 * 2 * x_blk + 2 * p_blk  # double-buffered in+out + params
    vmem_limit = int(max(32 << 20, min(56 << 20, vmem_need + (4 << 20))))

    cost = pl.CostEstimate(
        flops=2 * rows * cols,
        transcendentals=0,
        bytes_accessed=2 * rows * cols * itemsize + rows * 2 * 4,
    )

    kernel = functools.partial(_frozen_bn_kernel, fuse_relu=fuse_relu)

    out2 = pl.pallas_call(
        kernel,
        out_shape=jax.ShapeDtypeStruct((rows, cols), x.dtype),
        grid=(nr, nc),
        in_specs=[
            pl.BlockSpec((rb, cb), lambda i, j: (i, j)),  # x rows x lanes
            pl.BlockSpec((rb, 2), lambda i, j: (i, 0)),   # merged [scale, shift]
        ],
        out_specs=pl.BlockSpec((rb, cb), lambda i, j: (i, j)),
        compiler_params=pltpu.CompilerParams(
            dimension_semantics=("parallel", "parallel"),  # megacore-shardable
            vmem_limit_bytes=vmem_limit,
        ),
        cost_estimate=cost,
    )(x2, params)

    return out2.reshape(N, C, H, W)


def frozen_batch_norm_2d_ref(x, weight, bias, running_mean, running_var, eps=1e-5):
    w = weight.reshape(1, -1, 1, 1)
    b = bias.reshape(1, -1, 1, 1)
    rv = running_var.reshape(1, -1, 1, 1)
    rm = running_mean.reshape(1, -1, 1, 1)
    scale = w * jax.lax.rsqrt(rv + eps)
    shift = b - rm * scale
    return x * scale + shift


if __name__ == "__main__":
    key = jax.random.PRNGKey(0)
    kx, kw, kb, km, kv = jax.random.split(key, 5)

    N, C, H, W = 2, 4, 16, 16
    x = jax.random.normal(kx, (N, C, H, W), dtype=jnp.float32)

    # Deterministic "frozen" buffers (shapes match the module's __init__).
    weight = 1.0 + 0.1 * jax.random.normal(kw, (C,), dtype=jnp.float32)
    bias = 0.1 * jax.random.normal(kb, (C,), dtype=jnp.float32)
    running_mean = 0.2 * jax.random.normal(km, (C,), dtype=jnp.float32)
    running_var = jax.random.uniform(
        kv, (C,), minval=0.5, maxval=1.5, dtype=jnp.float32
    )

    out = jax.block_until_ready(
        frozen_batch_norm_2d(x, weight, bias, running_mean, running_var)
    )
    ref = frozen_batch_norm_2d_ref(x, weight, bias, running_mean, running_var)
    assert out.shape == (N, C, H, W)
    assert out.dtype == x.dtype
    assert jnp.allclose(out, ref, atol=1e-5, rtol=1e-5)

    # Optional fused-ReLU path (module semantics unchanged when fuse_relu=False).
    out_relu = jax.block_until_ready(
        frozen_batch_norm_2d(x, weight, bias, running_mean, running_var, fuse_relu=True)
    )
    assert jnp.allclose(out_relu, jnp.maximum(ref, 0.0), atol=1e-5, rtol=1e-5)

    print("KERNEL_OK")
</pallas_src>

<mosaic_0001>
module attributes {stable_mosaic.version = 11 : i64} {
  func.func @_frozen_bn_kernel(%arg0: i32, %arg1: i32, %arg2: memref<8x128xf32, #tpu.memory_space<vmem>>, %arg3: memref<8x2xf32, #tpu.memory_space<vmem>>, %arg4: memref<8x128xf32, #tpu.memory_space<vmem>>) attributes {dimension_semantics = [#tpu.dimension_semantics<parallel>, #tpu.dimension_semantics<parallel>], iteration_bounds = array<i64: 1, 2>, scalar_prefetch = 0 : i64, scratch_operands = 0 : i64, tpu.core_type = #tpu.core_type<tc>, window_params = [{transform_indices = @transform_0, window_bounds = array<i64: 8, 128>}, {transform_indices = @transform_1, window_bounds = array<i64: 8, 2>}, {transform_indices = @transform_2, window_bounds = array<i64: 8, 128>}]} {
    %c0 = arith.constant 0 : index
    %c0_0 = arith.constant 0 : index
    %0 = vector.load %arg2[%c0, %c0_0] : memref<8x128xf32, #tpu.memory_space<vmem>>, vector<8x128xf32>
    %c0_1 = arith.constant 0 : index
    %c0_2 = arith.constant 0 : index
    %1 = vector.load %arg3[%c0_1, %c0_2] : memref<8x2xf32, #tpu.memory_space<vmem>>, vector<8x1xf32>
    %c0_3 = arith.constant 0 : index
    %c1 = arith.constant 1 : index
    %2 = vector.load %arg3[%c0_3, %c1] : memref<8x2xf32, #tpu.memory_space<vmem>>, vector<8x1xf32>
    %3 = vector.broadcast %1 : vector<8x1xf32> to vector<8x128xf32>
    %4 = arith.mulf %0, %3 : vector<8x128xf32>
    %5 = vector.broadcast %2 : vector<8x1xf32> to vector<8x128xf32>
    %6 = arith.addf %4, %5 : vector<8x128xf32>
    %c0_4 = arith.constant 0 : index
    %c0_5 = arith.constant 0 : index
    %7 = vector.load %arg4[%c0_4, %c0_5] : memref<8x128xf32, #tpu.memory_space<vmem>>, vector<8x128xf32>
    tpu.vector_store %arg4[%c0_4, %c0_5], %6 {strides = array<i32>} : memref<8x128xf32, #tpu.memory_space<vmem>>, vector<8x128xf32>,
    return
  }
  func.func @transform_0(%arg0: i32, %arg1: i32) -> (i32, i32) {
    %c0_i32 = arith.constant 0 : i32
    return %arg0, %arg1 : i32, i32
  }
  func.func @transform_1(%arg0: i32, %arg1: i32) -> (i32, i32) {
    %c0_i32 = arith.constant 0 : i32
    %c0_i32_0 = arith.constant 0 : i32
    return %arg0, %c0_i32 : i32, i32
  }
  func.func @transform_2(%arg0: i32, %arg1: i32) -> (i32, i32) {
    %c0_i32 = arith.constant 0 : i32
    return %arg0, %arg1 : i32, i32
  }
}

</mosaic_0001>

<bundles_post_ra>
// kernel: tpu_custom_call.1
= control target key start
LH: loop header
LB: loop body
LE: loop exit
PB: predicated region body
PF: predicated region fallthrough
CT: control target
= control target key end

     0   :  { %7 = vsyncpa [#allocation3], 0  ;;  %s667_s0 = inlined_call_operand.hbm [shape: f32[8,256], index: 0, kind: input, shape index: {}]   ;;  %s668_s1 = inlined_call_operand.vmem [shape: f32[8,2], index: 1, kind: input, shape index: {}]   ;;  %s669_s2 = inlined_call_operand.hbm [shape: f32[8,256], index: 2, kind: output, shape index: {}]  }
   0x1   :  { %9 = vsyncpa [#allocation3 + $0x1], 0 }
   0x2   :  { %10 = vsyncpa [#allocation4], 0 }
   0x3   :  { %12 = vsyncpa [#allocation4 + $0x1], 0  ;;  %s530_s9 = smov 0   ;;  %s532_s10 = smov 0  }
   0x4   :  { %s534_s11 = smov 0   ;;  %s536_s12 = smov 0  }
   0x5   :  { %s538_s13 = smov 0   ;;  %s540_s14 = smov 0  }
   0x6 LB: > { %s321_s15 = sadd.s32 4294967295, %s509_s14   ;;  %s322_s16 = sadd.s32 4294967294, %s509_s14   ;;  %s509_s14 = sphi %s540_s14, %s18_s14   ;;  %s505_s13 = sphi %s538_s13, %s681_s13   ;;  %s501_s12 = sphi %s536_s12, %s680_s12   ;;  %s497_s11 = sphi %s534_s11, %s679_s11   ;;  %s493_s10 = sphi %s532_s10, %s678_s10   ;;  %s489_s9 = sphi %s530_s9, %s677_s9  }
   0x7   : > { %s27_s17 = sadd.s32 1, %s505_s13  ;;  %s39_s18 = sadd.s32 1, %s497_s11 }
   0x8   : > { %p28_p0 = scmp.ge.s32.totalorder %s27_s17, 2  ;;  %p46_p1 = scmp.ne.s32.totalorder %s497_s11, %s493_s10 }
   0x9   : > { %p47_p2 = scmp.eq.s32.totalorder %s509_s14, 0  ;;  %p52_p3 = scmp.ne.s32.totalorder %s493_s10, %s489_s9 }
   0xa   : > { %s683_s17 = smov (%p28_p0, %s27_s17), 0  ;;  %p53_p5 = scmp.eq.s32.totalorder %s321_s15, 0 }
   0xb   : > { %p571_p4 = por %p47_p2, %p46_p1  ;;  %s35_s20 = ssub.s32 %s505_s13, %s683_s17 }
   0xc   : > { %p104_p6 = scmp.eq.s32.totalorder %s321_s15, 1  ;;  %p37_p7 = scmp.eq.s32.totalorder %s35_s20, 0 }
   0xd   : > { %p577_p8 = por %p53_p5, %p52_p3  ;;  %p110_p10 = scmp.eq.s32.totalorder %s322_s16, 1 }
   0xe   : > { %p581_p9 = por %p104_p6, %p46_p1  ;;  %p347_p13 = scmp.lt.s32.totalorder %s509_s14, 2 }
   0xf   : > { %s586_s23 = scalar_select %p37_p7, %s497_s11, %s39_s18  }
  0x10   : > { %p588_p11 = por %p110_p10, %p52_p3  ;;  %s137_s25 = sand.u32 1, %s497_s11  }
  0x11   : > { %s326_s26 = sshll.u32 %s137_s25, 3  ;;  %s327_s27 = sshll.u32 %s505_s13, 7 }
  0x12   : > { %s673_s24 = scalar_select %p588_p11, 1, 0 }
  0x13   : > { %s148_s30 = scalar_lea.hbm %s667_s0, %s327_s27  ;;  %s141_s3 = scalar_lea.vmem [#allocation2], %s326_s26 }
  0x14   : > { %s150_s4 = sshll.u32 %s141_s3, 4  ;;  %p601_p0 = pnand %p347_p13, %p571_p4  ;;  %s151_s4 = int_to_ptr.vmem [resolvable:$true] %s150_s4 }
  0x15   : > { %p328_p1 = scmp.ge.s32.totalorder %s509_s14, 1  ;;  %p155_p2 = scmp.lt.s32.totalorder %s509_s14, 3 }
  0x16   : > { %s138_s6 = scalar_lea.sflag [#allocation3], %s137_s25  ;;  %p403_p3 = pneg %p601_p0 }
  0x17   : > { %s414_s7 = scalar_lea.vmem %s151_s4, 128  ;;  %s511_s8 = smov [#allocation2]  }
  0x18   : > { %p415_p5 = scmp.ne.s32.totalorder %s151_s4, %s414_s7  ;;  %s419_s15 = sshll.u32 %s511_s8, 4  ;;  %s420_s15 = int_to_ptr.vmem [resolvable:$false] %s419_s15 }
  0x19   : > { %s421_s16 = scalar_lea.vmem %s420_s15, 256  ;;  %p422_p10 = scmp.lt.s32.totalorder %s151_s4, %s420_s15 }
  0x1a   : > { %p417_p6 = pnand %p415_p5, %p403_p3  ;;  %p423_p12 = scmp.lt.s32.totalorder %s421_s16, %s414_s7 }
  0x1c   : > { %p418_p7 = pneg %p417_p6  ;;  %p424_p4 = por %p423_p12, %p422_p10 }
  0x1e   : > { %p425_p13 = pnand %p424_p4, %p418_p7 }
  0x20   : > { %428 = shalt.err (!%p425_p13)
}
  0x21   : > { %342 = dma.hbm_to_vmem [thread:$0]  (!%p601_p0), %s148_s30, 128, %s151_s4, %s138_s6  }
  0x22   : > { %p156_p11 = pnand %p328_p1, %p155_p2 }
  0x23   : > { %s616_s18 = sand.u32 (!%p156_p11), 1, %s493_s10  }
  0x24   : > { %159 = sbr.rel (%p156_p11) target bundleno = 188 (0xbc), region = 28  ;;  %s329_s19 = sshll.u32 (!%p156_p11), %s616_s18, 3 }
  0x25   : > { %s162_s20 = scalar_lea.sflag (!%p156_p11), [#allocation3], %s616_s18  ;;  %s165_s25 = scalar_lea.vmem (!%p156_p11), [#allocation2], %s329_s19 }
  0x29   : > { %480 = dma.done.wait (%p577_p8), %s162_s20, 128  }
  0x2a   : > { %482 = vsyncadd (%p577_p8), %s162_s20, 4294967168  ;;  %v512_v0 = vmov 0   ;;  %v195_v1 = vld [vmem:[%s668_s1] sm:$0xff]  ;;  %v513_v2 = vmov 1   ;;  %s332_s28 = sshll.u32 %s501_s12, 7  ;;  %s189_s29 = scalar_lea.vmem [#allocation5], %s329_s19 }
  0x2b   : > { %399 = vset.pattern.permute.xlu0 %v512_v0  ;;  %v194_v4 = vld [vmem:[%s165_s25] sm:$0xff]  ;;  %s224_s30 = sshll.u32 %s189_s29, 4  ;;  %s222_s4 = scalar_lea.hbm %s669_s2, %s332_s28  ;;  %s225_s30 = int_to_ptr.vmem [resolvable:$true] %s224_s30 }
  0x2c   : > { %198 = vperm.xlu0 %399, %v195_v1   ;;  %s209_s5 = scalar_lea.sflag [#allocation4], %s616_s18  ;;  %s429_s6 = scalar_lea.vmem %s225_s30, 128 }
  0x2d   : > { %p430_p8 = scmp.ne.s32.totalorder %s225_s30, %s429_s6  ;;  %s514_s7 = smov [#allocation5]  }
  0x2e   : > { %s433_s8 = sshll.u32 %s514_s7, 4  ;;  %s434_s8 = int_to_ptr.vmem [resolvable:$false] %s433_s8 }
  0x2f   : > { %p431_p11 = pnand %p430_p8, %p581_p9  ;;  %s435_s12 = scalar_lea.vmem %s434_s8, 256 }
  0x30   : > { %400 = vset.pattern.permute.xlu0 %v513_v2  ;;  %p436_p0 = scmp.lt.s32.totalorder %s225_s30, %s434_s8  ;;  %p437_p1 = scmp.lt.s32.totalorder %s435_s12, %s429_s6 }
  0x31   : > { %203 = vperm.xlu0 %400, %v195_v1   ;;  %p432_p12 = pneg %p431_p11 }
  0x32   : > { %p438_p2 = por %p437_p1, %p436_p0 }
  0x34   : > { %p439_p3 = pnand %p438_p2, %p432_p12 }
  0xa7   : > { %v199_v3 = vpop.permute.xlu0 %198 }
  0xa8   : > { %v201_v5 = vmul.f32 %v199_v3, %v194_v4 }
  0xac   : > { %v204_v6 = vpop.permute.xlu0 %203 }
  0xad   : > { %v206_v7 = vadd.f32 %v204_v6, %v201_v5 }
  0xaf   : > { %207 = vst [vmem:[%s189_s29] sm:$0xff] %v206_v7 }
  0xb0   : > { %442 = shalt.err (!%p439_p3)
}
  0xb1   : > { %s443_s15 = scalar_lea.hbm %s222_s4, 128  ;;  %s447_s19 = scalar_lea.hbm %s669_s2, 256 }
  0xb2   : > { %p444_p5 = scmp.ne.s32.totalorder %s222_s4, %s443_s15  ;;  %p448_p10 = scmp.lt.s32.totalorder %s222_s4, %s669_s2 }
  0xb3   : > { %p449_p4 = scmp.lt.s32.totalorder %s447_s19, %s443_s15 }
  0xb4   : > { %p445_p6 = pnand %p444_p5, %p581_p9 }
  0xb5   : > { %p450_p13 = por %p449_p4, %p448_p10 }
  0xb6   : > { %p446_p7 = pneg %p445_p6 }
  0xb8   : > { %p451_p8 = pnand %p450_p13, %p446_p7 }
  0xba   : > { %454 = shalt.err (!%p451_p8)
}
  0xbb   : > { %337 = dma.vmem_to_hbm [thread:$0]  (%p581_p9), %s225_s30, 128, %s222_s4, %s209_s5  }
  0xbc PF: > { %s236_s26 = sand.u32 1, %s489_s9   ;;  %p675_p11 = scmp.ne.s32.totalorder %s673_s24, 0 }
  0xbd   : > { %p676_p12 = scmp.ge.s32.totalorder %s509_s14, 2  ;;  %s237_s27 = scalar_lea.sflag [#allocation4], %s236_s26 }
  0xbf   : > { %p344_p0 = pnand %p676_p12, %p675_p11 }
  0xc1   : > { %p345_p1 = pneg %p344_p0 }
  0xc3   : > { %484 = dma.done.wait (%p345_p1), %s237_s27, 128  }
  0xc4   : > { %486 = vsyncadd (%p345_p1), %s237_s27, 4294967168  ;;  %s18_s14 = sadd.s32 1, %s509_s14   ;;  %s677_s9 = smov %s493_s10 }
  0xc5   : > { %p15_p2 = scmp.ge.s32.totalorder %s18_s14, 4   ;;  %s678_s10 = smov %s497_s11 }
  0xc6   : > { %s679_s11 = smov %s586_s23  ;;  %s680_s12 = smov %s505_s13 }
  0xc7   : > { %s681_s13 = smov %s683_s17  ;;  %17 = sbr.rel (!%p15_p2) target bundleno = 6 (0x6), region = 76 }
  0xcc   :  { %242 = vsyncpa [#allocation3], 1 }
  0xcd   :  { %244 = vsyncpa [#allocation3 + $0x1], 1 }
  0xce   :  { %245 = vsyncpa [#allocation4], 1 }
  0xcf   :  { %247 = vsyncpa [#allocation4 + $0x1], 1 }

</bundles_post_ra>
